<compile_context>
chip_gen: v7x
topology: tpu7x:2x2x1
jax: 0.10.0
libtpu: 0.0.40
codegen_flags: <defaults>
</compile_context>

<pallas_src>
import functools

import jax
import jax.numpy as jnp
from jax.experimental import pallas as pl
from jax.experimental.pallas import tpu as pltpu


def _round_up(x, m):
    return -(-x // m) * m


def _lane(d):
    return _round_up(max(int(d), 1), 128)


def _sub(d):
    return _round_up(max(int(d), 1), 8)


def _vmem_budget_bytes():
    """Per-generation scoped-VMEM budget (with headroom)."""
    try:
        kind = jax.devices()[0].device_kind.lower()
    except Exception:
        kind = ""
    if ("v5" in kind) or ("v6" in kind):
        return 96 << 20          # 128 MiB physical VMEM
    if ("v7" in kind) or ("7x" in kind):
        return 44 << 20          # 64 MiB physical per TensorCore
    return 40 << 20              # conservative default


def _tile_vmem_bytes(tn, s1, f, h1, h2p, in_item, out_item):
    """Per-grid-step VMEM estimate with lane/sublane padding + f32 intermediates."""
    rows = (1 + s1) * tn
    act_in = 2 * rows * _lane(f) * in_item                       # a + b slabs
    out_b = tn * _lane(h2p) * out_item
    w_b = 2 * (_sub(f) * _lane(h1) + _sub(h1) * _lane(h2p)) * in_item
    inter = 2 * rows * _lane(h1) * 4 + 4 * tn * _lane(h2p) * 4   # h0/hn/partials (f32)
    return 2 * (act_in + out_b + w_b) + inter                    # x2: double-buffering


def _sage_kernel(ar_ref, br_ref, an_ref, bn_ref,
                 w1a_ref, w1b_ref, w2a_ref, w2b_ref, out_ref, *, tn, s1):
    # ar/br: (tn, F)        roots  [feat_0 | mean_S1(feat_1)]
    # an/bn: (s1*tn, F)     neighbours, stacked s-SLOW per tile
    # w1a/w1b: (F, H1)      w2a/w2b: (H1, H2p), w2b pre-scaled by 1/S1
    h0 = jnp.dot(ar_ref[...], w1a_ref[...], preferred_element_type=jnp.float32)
    h0 = h0 + jnp.dot(br_ref[...], w1b_ref[...],
                      preferred_element_type=jnp.float32)
    h0 = jnp.maximum(h0, 0.0)                                    # (tn, H1)

    hn = jnp.dot(an_ref[...], w1a_ref[...], preferred_element_type=jnp.float32)
    hn = hn + jnp.dot(bn_ref[...], w1b_ref[...],
                      preferred_element_type=jnp.float32)
    hn = jnp.maximum(hn, 0.0)                                    # (s1*tn, H1)
    # dropout is identity in eval mode (deterministic kernel)

    # Mean over the S1 fan-out: tree-reduced sum of contiguous (tn, H1) slabs
    # (the 1/S1 factor is folded into w2b by the wrapper).
    slabs = [hn[s * tn:(s + 1) * tn] for s in range(s1)]
    while len(slabs) > 1:
        nxt = [slabs[i] + slabs[i + 1] for i in range(0, len(slabs) - 1, 2)]
        if len(slabs) % 2:
            nxt.append(slabs[-1])
        slabs = nxt
    h1 = slabs[0]                                                # (tn, H1)

    dt = w2a_ref.dtype
    out = jnp.dot(h0.astype(dt), w2a_ref[...], preferred_element_type=jnp.float32)
    out = out + jnp.dot(h1.astype(dt), w2b_ref[...],
                        preferred_element_type=jnp.float32)
    out_ref[...] = jnp.maximum(out, 0.0).astype(out_ref.dtype)   # (tn, H2p)


def graphsage_forward(forest, feature_matrix, w1, w2, *, tile_n=1024,
                      compute_dtype=jnp.bfloat16):
    """forest = (idx0 (N,), idx1 (N,S1), idx2 (N*S1,S2)); w1 (2F,H1), w2 (2H1,H2)."""
    forest0, forest1, forest2 = forest
    N = int(forest0.shape[0])
    S1 = int(forest1.shape[1])
    S2 = int(forest2.shape[1])
    F = int(feature_matrix.shape[1])
    H1 = int(w1.shape[1])
    H2 = int(w2.shape[1])
    out_dtype = feature_matrix.dtype
    if compute_dtype is None:
        compute_dtype = feature_matrix.dtype
    in_item = jnp.dtype(compute_dtype).itemsize
    out_item = jnp.dtype(out_dtype).itemsize
    H2p = _round_up(H2, 128)                 # lane-dense (unmasked) output stores

    # ---- tile sizing: sublane-aligned, VMEM-fit per generation, >=2 tiles so
    # the "parallel" axis can shard across v7x's two TensorCores.
    n_r = _round_up(N, 8)
    tn = max(8, min(_round_up(tile_n, 8), n_r))
    budget = _vmem_budget_bytes()
    while tn > 8 and _tile_vmem_bytes(tn, S1, F, H1, H2p, in_item, out_item) > budget:
        tn = max(8, _round_up(tn // 2, 8))
    if n_r >= 16 and pl.cdiv(n_r, tn) < 2:
        tn = max(8, _round_up(pl.cdiv(n_r, 2), 8))
    nblk = pl.cdiv(n_r, tn)
    n_pad = nblk * tn
    rows = (1 + S1) * tn

    # ---- pad + permute the (tiny int32) gather indices so the gathered float
    # slabs come out of XLA already in per-tile [s-slow, row-fast] order:
    # no transpose/concat of the big activation tensors ever touches HBM.
    pad = n_pad - N
    idx0 = jnp.pad(forest0, (0, pad))                                   # (n_pad,)
    idx1 = jnp.pad(forest1, ((0, pad), (0, 0)))                         # (n_pad, S1)
    idx2 = jnp.pad(forest2.reshape(N, S1, S2), ((0, pad), (0, 0), (0, 0)))
    idx1_p = idx1.reshape(nblk, tn, S1).transpose(0, 2, 1).reshape(-1)  # (n_pad*S1,)
    idx2_p = idx2.reshape(nblk, tn, S1, S2).transpose(0, 2, 1, 3).reshape(-1, S2)

    # TODO(synk): data-dependent gathers + S1/S2 means stay in plain-JAX glue
    # (XLA fuses gather+reduce); the 2-hop tensor is reduced over S2 before the
    # kernel so it never reaches VMEM.
    a_root = feature_matrix[idx0].astype(compute_dtype)                 # (n_pad, F)
    b_root = feature_matrix[idx1].mean(axis=1).astype(compute_dtype)    # (n_pad, F)
    a_nbr = feature_matrix[idx1_p].astype(compute_dtype)                # (n_pad*S1, F)
    b_nbr = feature_matrix[idx2_p].mean(axis=1).astype(compute_dtype)   # (n_pad*S1, F)

    # Weights: split the concatenated-input layout, fold 1/S1 into w2b, and
    # zero-pad w2 columns to the lane-dense output width.
    w1a = w1[:F].astype(compute_dtype)
    w1b = w1[F:].astype(compute_dtype)
    w2a = jnp.pad(w2[:H1], ((0, 0), (0, H2p - H2))).astype(compute_dtype)
    w2b = jnp.pad(w2[H1:] / jnp.asarray(S1, w2.dtype),
                  ((0, 0), (0, H2p - H2))).astype(compute_dtype)

    flops = nblk * (2 * rows * (2 * F) * H1 + 2 * tn * (2 * H1) * H2p)
    bytes_accessed = int((a_root.size + b_root.size + a_nbr.size + b_nbr.size
                          + w1a.size + w1b.size + w2a.size + w2b.size) * in_item
                         + n_pad * H2p * out_item)

    out = pl.pallas_call(
        functools.partial(_sage_kernel, tn=tn, s1=S1),
        out_shape=jax.ShapeDtypeStruct((n_pad, H2p), out_dtype),
        grid=(nblk,),
        in_specs=[
            pl.BlockSpec((tn, F), lambda i: (i, 0)),           # roots: feat_0
            pl.BlockSpec((tn, F), lambda i: (i, 0)),           # roots: mean_S1(feat_1)
            pl.BlockSpec((S1 * tn, F), lambda i: (i, 0)),      # nbrs:  feat_1 (s-slow)
            pl.BlockSpec((S1 * tn, F), lambda i: (i, 0)),      # nbrs:  mean_S2(feat_2)
            pl.BlockSpec((F, H1), lambda i: (0, 0)),           # resident weights
            pl.BlockSpec((F, H1), lambda i: (0, 0)),
            pl.BlockSpec((H1, H2p), lambda i: (0, 0)),
            pl.BlockSpec((H1, H2p), lambda i: (0, 0)),
        ],
        out_specs=pl.BlockSpec((tn, H2p), lambda i: (i, 0)),
        compiler_params=pltpu.CompilerParams(
            dimension_semantics=("parallel",),      # shards tiles over v7x's 2 TCs
            vmem_limit_bytes=int(budget)),
        cost_estimate=pl.CostEstimate(flops=int(flops), transcendentals=0,
                                      bytes_accessed=bytes_accessed),
    )(a_root, b_root, a_nbr, b_nbr, w1a, w1b, w2a, w2b)

    return out[:N, :H2]


def graphsage_reference(forest, feature_matrix, w1, w2):
    """Pure-JAX transliteration of the PyTorch forward (dropout = eval mode)."""
    f0_idx, f1_idx, f2_idx = forest
    feat_dim = feature_matrix.shape[1]
    H1 = w1.shape[1]
    feat_0 = feature_matrix[f0_idx]
    feat_1 = feature_matrix[f1_idx]
    x = feature_matrix[f1_idx].mean(axis=1)
    feat_0 = jnp.concatenate((feat_0, x), axis=1)
    feat_0 = jax.nn.relu(feat_0 @ w1)
    x = feature_matrix[f2_idx].mean(axis=1)
    feat_1 = jnp.concatenate((feat_1.reshape(-1, feat_dim), x), axis=1)
    feat_1 = jax.nn.relu(feat_1 @ w1)
    feat_1 = feat_1.reshape(f0_idx.shape[0], -1, H1).mean(axis=1)
    combined = jnp.concatenate((feat_0, feat_1), axis=1)
    return jax.nn.relu(combined @ w2)


if __name__ == "__main__":
    feat_dim, hidden_dim1, hidden_dim2 = 16, 32, 32
    S1, S2, num_nodes = 4, 4, 64

    key = jax.random.PRNGKey(0)
    k_feat, k_f0, k_f1, k_f2, k_w1, k_w2, k_g0, k_g1, k_g2 = jax.random.split(key, 9)

    feature_matrix = jax.random.normal(k_feat, (num_nodes, feat_dim),
                                       dtype=jnp.float32)
    b1 = 1.0 / jnp.sqrt(2.0 * feat_dim)
    b2 = 1.0 / jnp.sqrt(2.0 * hidden_dim1)
    w1 = jax.random.uniform(k_w1, (2 * feat_dim, hidden_dim1),
                            minval=-b1, maxval=b1, dtype=jnp.float32)
    w2 = jax.random.uniform(k_w2, (2 * hidden_dim1, hidden_dim2),
                            minval=-b2, maxval=b2, dtype=jnp.float32)

    # --- case 1: small, single-tile batch -----------------------------------
    N = 8
    forest = (jax.random.randint(k_f0, (N,), 0, num_nodes),
              jax.random.randint(k_f1, (N, S1), 0, num_nodes),
              jax.random.randint(k_f2, (N * S1, S2), 0, num_nodes))
    ref = jax.block_until_ready(graphsage_reference(forest, feature_matrix, w1, w2))

    out_f32 = jax.block_until_ready(
        graphsage_forward(forest, feature_matrix, w1, w2,
                          compute_dtype=jnp.float32))
    assert out_f32.shape == (N, hidden_dim2), out_f32.shape
    assert jnp.allclose(out_f32, ref, rtol=1e-5, atol=1e-5), (
        float(jnp.max(jnp.abs(out_f32 - ref))))

    out_bf16 = jax.block_until_ready(
        graphsage_forward(forest, feature_matrix, w1, w2))   # default bf16 path
    assert out_bf16.shape == (N, hidden_dim2), out_bf16.shape
    assert jnp.allclose(out_bf16, ref, rtol=5e-2, atol=5e-2), (
        float(jnp.max(jnp.abs(out_bf16 - ref))))

    # --- case 2: non-divisible N exercising padding + multi-tile grid --------
    N2 = 40
    forest2t = (jax.random.randint(k_g0, (N2,), 0, num_nodes),
                jax.random.randint(k_g1, (N2, S1), 0, num_nodes),
                jax.random.randint(k_g2, (N2 * S1, S2), 0, num_nodes))
    ref2 = jax.block_until_ready(graphsage_reference(forest2t, feature_matrix, w1, w2))
    out2 = jax.block_until_ready(
        graphsage_forward(forest2t, feature_matrix, w1, w2,
                          compute_dtype=jnp.float32))
    assert out2.shape == (N2, hidden_dim2), out2.shape
    assert jnp.allclose(out2, ref2, rtol=1e-5, atol=1e-5), (
        float(jnp.max(jnp.abs(out2 - ref2))))

    print("KERNEL_OK")
</pallas_src>

<mosaic_0001>
module attributes {stable_mosaic.version = 11 : i64} {
  func.func @_sage_kernel(%arg0: i32, %arg1: memref<8x16xf32, #tpu.memory_space<vmem>>, %arg2: memref<8x16xf32, #tpu.memory_space<vmem>>, %arg3: memref<32x16xf32, #tpu.memory_space<vmem>>, %arg4: memref<32x16xf32, #tpu.memory_space<vmem>>, %arg5: memref<16x32xf32, #tpu.memory_space<vmem>>, %arg6: memref<16x32xf32, #tpu.memory_space<vmem>>, %arg7: memref<32x128xf32, #tpu.memory_space<vmem>>, %arg8: memref<32x128xf32, #tpu.memory_space<vmem>>, %arg9: memref<8x128xf32, #tpu.memory_space<vmem>>) attributes {dimension_semantics = [#tpu.dimension_semantics<parallel>], iteration_bounds = array<i64: 1>, scalar_prefetch = 0 : i64, scratch_operands = 0 : i64, tpu.core_type = #tpu.core_type<tc>, window_params = [{transform_indices = @transform_0, window_bounds = array<i64: 8, 16>}, {transform_indices = @transform_1, window_bounds = array<i64: 8, 16>}, {transform_indices = @transform_2, window_bounds = array<i64: 32, 16>}, {transform_indices = @transform_3, window_bounds = array<i64: 32, 16>}, {pipeline_mode = #tpu.pipeline_mode<synchronous>, transform_indices = @transform_4, window_bounds = array<i64: 16, 32>}, {pipeline_mode = #tpu.pipeline_mode<synchronous>, transform_indices = @transform_5, window_bounds = array<i64: 16, 32>}, {pipeline_mode = #tpu.pipeline_mode<synchronous>, transform_indices = @transform_6, window_bounds = array<i64: 32, 128>}, {pipeline_mode = #tpu.pipeline_mode<synchronous>, transform_indices = @transform_7, window_bounds = array<i64: 32, 128>}, {transform_indices = @transform_8, window_bounds = array<i64: 8, 128>}]} {
    %c0 = arith.constant 0 : index
    %c0_0 = arith.constant 0 : index
    %0 = vector.load %arg1[%c0, %c0_0] : memref<8x16xf32, #tpu.memory_space<vmem>>, vector<8x16xf32>
    %c0_1 = arith.constant 0 : index
    %c0_2 = arith.constant 0 : index
    %1 = vector.load %arg5[%c0_1, %c0_2] : memref<16x32xf32, #tpu.memory_space<vmem>>, vector<16x32xf32>
    %cst = arith.constant dense<0.000000e+00> : vector<8x32xf32>
    %2 = tpu.matmul %0, %1, %cst {dimension_numbers = #tpu.dot_dimension_numbers<[1], [0], [0], [1], [0, 0, 1, 1], [], []>} : vector<8x16xf32>, vector<16x32xf32>, vector<8x32xf32> -> vector<8x32xf32>
    %c0_3 = arith.constant 0 : index
    %c0_4 = arith.constant 0 : index
    %3 = vector.load %arg2[%c0_3, %c0_4] : memref<8x16xf32, #tpu.memory_space<vmem>>, vector<8x16xf32>
    %c0_5 = arith.constant 0 : index
    %c0_6 = arith.constant 0 : index
    %4 = vector.load %arg6[%c0_5, %c0_6] : memref<16x32xf32, #tpu.memory_space<vmem>>, vector<16x32xf32>
    %cst_7 = arith.constant dense<0.000000e+00> : vector<8x32xf32>
    %5 = tpu.matmul %3, %4, %cst_7 {dimension_numbers = #tpu.dot_dimension_numbers<[1], [0], [0], [1], [0, 0, 1, 1], [], []>} : vector<8x16xf32>, vector<16x32xf32>, vector<8x32xf32> -> vector<8x32xf32>
    %6 = arith.addf %2, %5 : vector<8x32xf32>
    %cst_8 = arith.constant 0.000000e+00 : f32
    %7 = vector.broadcast %cst_8 : f32 to vector<8x32xf32>
    %8 = arith.maximumf %6, %7 : vector<8x32xf32>
    %c0_9 = arith.constant 0 : index
    %c0_10 = arith.constant 0 : index
    %9 = vector.load %arg3[%c0_9, %c0_10] : memref<32x16xf32, #tpu.memory_space<vmem>>, vector<32x16xf32>
    %c0_11 = arith.constant 0 : index
    %c0_12 = arith.constant 0 : index
    %10 = vector.load %arg5[%c0_11, %c0_12] : memref<16x32xf32, #tpu.memory_space<vmem>>, vector<16x32xf32>
    %cst_13 = arith.constant dense<0.000000e+00> : vector<32x32xf32>
    %11 = tpu.matmul %9, %10, %cst_13 {dimension_numbers = #tpu.dot_dimension_numbers<[1], [0], [0], [1], [0, 0, 1, 1], [], []>} : vector<32x16xf32>, vector<16x32xf32>, vector<32x32xf32> -> vector<32x32xf32>
    %c0_14 = arith.constant 0 : index
    %c0_15 = arith.constant 0 : index
    %12 = vector.load %arg4[%c0_14, %c0_15] : memref<32x16xf32, #tpu.memory_space<vmem>>, vector<32x16xf32>
    %c0_16 = arith.constant 0 : index
    %c0_17 = arith.constant 0 : index
    %13 = vector.load %arg6[%c0_16, %c0_17] : memref<16x32xf32, #tpu.memory_space<vmem>>, vector<16x32xf32>
    %cst_18 = arith.constant dense<0.000000e+00> : vector<32x32xf32>
    %14 = tpu.matmul %12, %13, %cst_18 {dimension_numbers = #tpu.dot_dimension_numbers<[1], [0], [0], [1], [0, 0, 1, 1], [], []>} : vector<32x16xf32>, vector<16x32xf32>, vector<32x32xf32> -> vector<32x32xf32>
    %15 = arith.addf %11, %14 : vector<32x32xf32>
    %cst_19 = arith.constant 0.000000e+00 : f32
    %16 = vector.broadcast %cst_19 : f32 to vector<32x32xf32>
    %17 = arith.maximumf %15, %16 : vector<32x32xf32>
    %18 = vector.extract_strided_slice %17 {offsets = [0, 0], sizes = [8, 32], strides = [1, 1]} : vector<32x32xf32> to vector<8x32xf32>
    %19 = vector.extract_strided_slice %17 {offsets = [8, 0], sizes = [8, 32], strides = [1, 1]} : vector<32x32xf32> to vector<8x32xf32>
    %20 = vector.extract_strided_slice %17 {offsets = [16, 0], sizes = [8, 32], strides = [1, 1]} : vector<32x32xf32> to vector<8x32xf32>
    %21 = vector.extract_strided_slice %17 {offsets = [24, 0], sizes = [8, 32], strides = [1, 1]} : vector<32x32xf32> to vector<8x32xf32>
    %22 = arith.addf %18, %19 : vector<8x32xf32>
    %23 = arith.addf %20, %21 : vector<8x32xf32>
    %24 = arith.addf %22, %23 : vector<8x32xf32>
    %c0_20 = arith.constant 0 : index
    %c0_21 = arith.constant 0 : index
    %25 = vector.load %arg7[%c0_20, %c0_21] : memref<32x128xf32, #tpu.memory_space<vmem>>, vector<32x128xf32>
    %cst_22 = arith.constant dense<0.000000e+00> : vector<8x128xf32>
    %26 = tpu.matmul %8, %25, %cst_22 {dimension_numbers = #tpu.dot_dimension_numbers<[1], [0], [0], [1], [0, 0, 1, 1], [], []>} : vector<8x32xf32>, vector<32x128xf32>, vector<8x128xf32> -> vector<8x128xf32>
    %c0_23 = arith.constant 0 : index
    %c0_24 = arith.constant 0 : index
    %27 = vector.load %arg8[%c0_23, %c0_24] : memref<32x128xf32, #tpu.memory_space<vmem>>, vector<32x128xf32>
    %cst_25 = arith.constant dense<0.000000e+00> : vector<8x128xf32>
    %28 = tpu.matmul %24, %27, %cst_25 {dimension_numbers = #tpu.dot_dimension_numbers<[1], [0], [0], [1], [0, 0, 1, 1], [], []>} : vector<8x32xf32>, vector<32x128xf32>, vector<8x128xf32> -> vector<8x128xf32>
    %29 = arith.addf %26, %28 : vector<8x128xf32>
    %cst_26 = arith.constant 0.000000e+00 : f32
    %30 = vector.broadcast %cst_26 : f32 to vector<8x128xf32>
    %31 = arith.maximumf %29, %30 : vector<8x128xf32>
    %c0_27 = arith.constant 0 : index
    %c0_28 = arith.constant 0 : index
    %32 = vector.load %arg9[%c0_27, %c0_28] : memref<8x128xf32, #tpu.memory_space<vmem>>, vector<8x128xf32>
    tpu.vector_store %arg9[%c0_27, %c0_28], %31 {strides = array<i32>} : memref<8x128xf32, #tpu.memory_space<vmem>>, vector<8x128xf32>,
    return
  }
  func.func @transform_0(%arg0: i32) -> (i32, i32) {
    %c0_i32 = arith.constant 0 : i32
    %c0_i32_0 = arith.constant 0 : i32
    return %arg0, %c0_i32 : i32, i32
  }
  func.func @transform_1(%arg0: i32) -> (i32, i32) {
    %c0_i32 = arith.constant 0 : i32
    %c0_i32_0 = arith.constant 0 : i32
    return %arg0, %c0_i32 : i32, i32
  }
  func.func @transform_2(%arg0: i32) -> (i32, i32) {
    %c0_i32 = arith.constant 0 : i32
    %c0_i32_0 = arith.constant 0 : i32
    return %arg0, %c0_i32 : i32, i32
  }
  func.func @transform_3(%arg0: i32) -> (i32, i32) {
    %c0_i32 = arith.constant 0 : i32
    %c0_i32_0 = arith.constant 0 : i32
    return %arg0, %c0_i32 : i32, i32
  }
  func.func @transform_4(%arg0: i32) -> (i32, i32) {
    %c0_i32 = arith.constant 0 : i32
    %c0_i32_0 = arith.constant 0 : i32
    %c0_i32_1 = arith.constant 0 : i32
    return %c0_i32, %c0_i32_0 : i32, i32
  }
  func.func @transform_5(%arg0: i32) -> (i32, i32) {
    %c0_i32 = arith.constant 0 : i32
    %c0_i32_0 = arith.constant 0 : i32
    %c0_i32_1 = arith.constant 0 : i32
    return %c0_i32, %c0_i32_0 : i32, i32
  }
  func.func @transform_6(%arg0: i32) -> (i32, i32) {
    %c0_i32 = arith.constant 0 : i32
    %c0_i32_0 = arith.constant 0 : i32
    %c0_i32_1 = arith.constant 0 : i32
    return %c0_i32, %c0_i32_0 : i32, i32
  }
  func.func @transform_7(%arg0: i32) -> (i32, i32) {
    %c0_i32 = arith.constant 0 : i32
    %c0_i32_0 = arith.constant 0 : i32
    %c0_i32_1 = arith.constant 0 : i32
    return %c0_i32, %c0_i32_0 : i32, i32
  }
  func.func @transform_8(%arg0: i32) -> (i32, i32) {
    %c0_i32 = arith.constant 0 : i32
    %c0_i32_0 = arith.constant 0 : i32
    return %arg0, %c0_i32 : i32, i32
  }
}

</mosaic_0001>

<bundles_post_ra>
// kernel: tpu_custom_call.1
= control target key start
LH: loop header
LB: loop body
LE: loop exit
PB: predicated region body
PF: predicated region fallthrough
CT: control target
= control target key end

     0   :  { %13 = vsyncpa [#allocation3], 0  ;;  %s968_s0 = inlined_call_operand.hbm [shape: f32[8,16], index: 0, kind: input, shape index: {}]   ;;  %s969_s1 = inlined_call_operand.hbm [shape: f32[8,16], index: 1, kind: input, shape index: {}]   ;;  %s970_s2 = inlined_call_operand.vmem [shape: f32[32,16], index: 2, kind: input, shape index: {}]   ;;  %s971_s3 = inlined_call_operand.vmem [shape: f32[32,16], index: 3, kind: input, shape index: {}]   ;;  %s972_s4 = inlined_call_operand.vmem [shape: f32[16,32], index: 4, kind: input, shape index: {}]   ;;  %s973_s5 = inlined_call_operand.vmem [shape: f32[16,32], index: 5, kind: input, shape index: {}]   ;;  %s974_s6 = inlined_call_operand.vmem [shape: f32[32,128], index: 6, kind: input, shape index: {}]   ;;  %s975_s7 = inlined_call_operand.vmem [shape: f32[32,128], index: 7, kind: input, shape index: {}]   ;;  %s976_s8 = inlined_call_operand.hbm [shape: f32[8,128], index: 8, kind: output, shape index: {}]  }
   0x1   :  { %14 = vsyncpa [#allocation6], 0 }
   0x2   :  { %15 = vsyncpa [#allocation4], 0  ;;  %s797_s27 = smov [#allocation2]   ;;  %s798_s29 = smov [#allocation5]  }
   0x3   :  { %s22_s28 = sshll.u32 %s797_s27, 4  ;;  %s32_s30 = sshll.u32 %s798_s29, 4  ;;  %s23_s28 = int_to_ptr.vmem [resolvable:$true] %s22_s28  ;;  %s33_s30 = int_to_ptr.vmem [resolvable:$true] %s32_s30 }
   0x4   :  { %s725_s11 = scalar_lea.hbm %s968_s0, 128 }
   0x5   :  { %p726_p0 = scmp.ne.s32.totalorder %s968_s0, %s725_s11  ;;  %p729_p1 = scmp.lt.u32.totalorder %s725_s11, %s968_s0 }
   0x7   :  { %p731_p2 = pnand %p729_p1, %p726_p0 }
   0x9   :  { %734 = shalt.err (!%p731_p2)
}
   0xa   :  { %s735_s16 = scalar_lea.vmem %s23_s28, 128  ;;  %p740_p4 = scmp.lt.s32.totalorder %s23_s28, %s23_s28 }
   0xb   :  { %p736_p3 = scmp.ne.s32.totalorder %s23_s28, %s735_s16  ;;  %p741_p5 = scmp.lt.s32.totalorder %s735_s16, %s735_s16 }
   0xd   :  { %p742_p6 = por %p741_p5, %p740_p4 }
   0xf   :  { %p743_p7 = pnand %p742_p6, %p736_p3 }
  0x11   :  { %746 = shalt.err (!%p743_p7)
}
  0x12   :  { %25 = dma.hbm_to_vmem [thread:$0]  %s968_s0, 128, %s23_s28, [#allocation3]  }
  0x13   :  { %s747_s21 = scalar_lea.hbm %s969_s1, 128 }
  0x14   :  { %p748_p8 = scmp.ne.s32.totalorder %s969_s1, %s747_s21  ;;  %p751_p9 = scmp.lt.u32.totalorder %s747_s21, %s969_s1 }
  0x16   :  { %p753_p10 = pnand %p751_p9, %p748_p8 }
  0x18   :  { %756 = shalt.err (!%p753_p10)
}
  0x19   :  { %s757_s26 = scalar_lea.vmem %s33_s30, 128  ;;  %p762_p12 = scmp.lt.s32.totalorder %s33_s30, %s33_s30 }
  0x1a   :  { %p758_p11 = scmp.ne.s32.totalorder %s33_s30, %s757_s26  ;;  %p763_p13 = scmp.lt.s32.totalorder %s757_s26, %s757_s26 }
  0x1c   :  { %p764_p0 = por %p763_p13, %p762_p12 }
  0x1e   :  { %p765_p1 = pnand %p764_p0, %p758_p11 }
  0x20   :  { %768 = shalt.err (!%p765_p1)
}
  0x21   :  { %35 = dma.hbm_to_vmem [thread:$0]  %s969_s1, 128, %s33_s30, [#allocation6]  }
  0x22   :  { %791 = dma.done.wait [#allocation3], 128  }
  0x23   :  { %792 = vsyncadd [#allocation3], 4294967168 }
  0x24   :  { %793 = dma.done.wait [#allocation6], 128  }
  0x25   :  { %794 = vsyncadd [#allocation6], 4294967168  ;;  %v799_v0 = vmov 0.0|0.0   ;;  %vm800_vm0 = vmmov 0   ;;  %v801_v1 = vmov 0.0   ;;  %v58_v2 = vld [vmem:[%s973_s5] sm:$0xff] }
  0x26   :  { %686 = vmatprep.subr.bf16.mxu1 %v799_v0  ;;  %689 = vmatprep.subr.bf16.mxu0 %v799_v0  ;;  %v59_v3 = vld [vmem:[%s973_s5 + $0x8] sm:$0xff]  ;;  %v55_v4 = vld [vmem:[%s972_s4] sm:$0xff]  ;;  %vm60_vm1 = vcmask 130048   ;;  %v214_v12 = vld [vmem:[%s971_s3 + $0x10] sm:$0xff]  ;;  %vm425_vm2 = vcmask 261120  }
  0x27   :  { %634 = vmatprep.mubr.msk.f32.mxu1 %vm800_vm0, %v801_v1  ;;  %641 = vmatprep.mubr.msk.f32.mxu0 %vm800_vm0, %v801_v1  ;;  %v687_v5 = vpack.c.bf16 %v59_v3, %v58_v2  ;;  %v56_v6 = vld [vmem:[%s972_s4 + $0x8] sm:$0xff]  ;;  %v54_v9 = vld [vmem:[#allocation2] sm:$0xff]  ;;  %v215_v13 = vld [vmem:[%s971_s3 + $0x18] sm:$0xff]  ;;  %s802_s4 = smov [#allocation7]  }
  0x28   :  { %v690_v7 = vpack.c.bf16 %v56_v6, %v55_v4  ;;  %v57_v8 = vld [vmem:[#allocation5] sm:$0xff]  ;;  %v212_v10 = vld [vmem:[%s971_s3] sm:$0xff]  ;;  %v210_v16 = vld [vmem:[%s970_s2 + $0x10] sm:$0xff]  ;;  %s580_s15 = sshll.u32 %s802_s4, 4  ;;  %s581_s15 = int_to_ptr.vmem [resolvable:$true] %s580_s15 }
  0x29   :  { %688 = vmatpush3.bf16.msra.mxu1 %v687_v5  ;;  %v213_v11 = vld [vmem:[%s971_s3 + $0x8] sm:$0xff]  ;;  %v208_v14 = vld [vmem:[%s970_s2] sm:$0xff]  ;;  %v211_v17 = vld [vmem:[%s970_s2 + $0x18] sm:$0xff]  ;;  %s769_s16 = scalar_lea.vmem %s581_s15, 128  ;;  %p774_p3 = scmp.lt.s32.totalorder %s581_s15, %s581_s15 }
  0x2a   :  { %691 = vmatpush3.bf16.msra.mxu0 %v690_v7  ;;  %693 = vmatprep.subr.bf16.mxu1 %v687_v5  ;;  %v209_v15 = vld [vmem:[%s970_s2 + $0x8] sm:$0xff]  ;;  %v421_v18 = vld [vmem:[%s975_s7] sm:$0xff]  ;;  %v423_v21 = vld [vmem:[%s975_s7 + $0x10] sm:$0xff]  ;;  %p770_p2 = scmp.ne.s32.totalorder %s581_s15, %s769_s16  ;;  %p775_p4 = scmp.lt.s32.totalorder %s769_s16, %s769_s16 }
  0x2b   :  { %700 = vmatprep.subr.bf16.mxu0 %v799_v0  ;;  %v422_v19 = vld [vmem:[%s975_s7 + $0x8] sm:$0xff]  ;;  %v424_v22 = vld [vmem:[%s975_s7 + $0x18] sm:$0xff]  ;;  %v417_v38 = vld [vmem:[%s974_s6] sm:$0xff] }
  0x2c   :  { %635 = vmatmul.mubr.msk.f32.vlgmr.msra.gmra.mrb[0].mxu1 %vm60_vm1, %v57_v8  ;;  %v701_v20 = vpack.c.bf16 %v422_v19, %v421_v18  ;;  %v704_v23 = vpack.c.bf16 %v424_v22, %v423_v21  ;;  %v418_v39 = vld [vmem:[%s974_s6 + $0x8] sm:$0xff]  ;;  %v419_v43 = vld [vmem:[%s974_s6 + $0x10] sm:$0xff]  ;;  %v420_v44 = vld [vmem:[%s974_s6 + $0x18] sm:$0xff]  ;;  %p776_p5 = por %p775_p4, %p774_p3 }
  0x2d   :  { %642 = vmatmul.mubr.msk.f32.vlgmr.msra.gmra.mrb[0].mxu0 %vm60_vm1, %v54_v9  ;;  %695 = vmatpush3.bf16.msra.mxu1 %v687_v5  ;;  %v707_v41 = vpack.c.bf16 %v418_v39, %v417_v38  ;;  %v710_v45 = vpack.c.bf16 %v420_v44, %v419_v43 }
  0x2e   :  { %648 = vmatprep.mubr.msk.f32.mxu1 %vm60_vm1, %v212_v10  ;;  %697 = vmatprep.subr.bf16.mxu1 %v690_v7  ;;  %p777_p6 = pnand %p776_p5, %p770_p2 }
  0x2f   :  { %672 = vmatprep.mubr.msk.f32.mxu0 %vm800_vm0, %v801_v1  ;;  %702 = vmatpush3.bf16.msra.mxu0 %v701_v20 }
  0x30   :  { %649 = vmatmul.mubr.msk.f32.vlgmr.msra.gmra.mrb[2].mxu1 %vm60_vm1, %v213_v11  ;;  %703 = vmatprep.subr.bf16.mxu0 %v799_v0 }
  0x31   :  { %699 = vmatpush3.bf16.msra.mxu1 %v690_v7  ;;  %651 = vmatprep.mubr.msk.f32.mxu1 %vm60_vm1, %v214_v12 }
  0x33   :  { %705 = vmatpush3.bf16.msra.mxu0 %v704_v23 }
  0x34   :  { %652 = vmatmul.mubr.msk.f32.gmra.mrb[4].mxu1 %vm60_vm1, %v215_v13  ;;  %706 = vmatprep.subr.bf16.mxu0 %v799_v0 }
  0x35   :  { %658 = vmatprep.mubr.msk.f32.mxu1 %vm60_vm1, %v208_v14 }
  0x38   :  { %659 = vmatmul.mubr.msk.f32.vlgmr.msra.gmra.mrb[2].mxu1 %vm60_vm1, %v209_v15 }
  0x39   :  { %661 = vmatprep.mubr.msk.f32.mxu1 %vm60_vm1, %v210_v16 }
  0x3c   :  { %662 = vmatmul.mubr.msk.f32.gmra.mrb[4].mxu1 %vm60_vm1, %v211_v17 }
  0xff   :  { %v130_v24 = vpop.f32.mrb[0].mxu1 }
 0x100   :  { %v636_v25 = vpop.f32.mrb[1].mxu1  ;;  %v203_v26 = vpop.f32.mrb[0].mxu0 }
 0x101   :  { %v204_v27 = vadd.f32 %v203_v26, %v130_v24  ;;  %v643_v28 = vpop.f32.mrb[1].mxu0 }
 0x103   :  { %v207_v46 = vmax.f32 %v204_v27, 0.0 }
 0x10b   :  { %v660_v29 = vpop.f32.mrb[2].mxu1 }
 0x10c   :  { %v411_v30 = vmax.f32 %v660_v29, 0.0  ;;  %v391_v31 = vpop.f32.mrb[3].mxu1 }
 0x10d   :  { %v410_v32 = vmax.f32 %v391_v31, 0.0 }
 0x10f   :  { %v414_v33 = vadd.f32 %v411_v30, %v410_v32  ;;  %v663_v34 = vpop.f32.mrb[4].mxu1 }
 0x110   :  { %v413_v35 = vmax.f32 %v663_v34, 0.0  ;;  %v401_v36 = vpop.f32.mrb[5].mxu1 }
 0x111   :  { %v412_v37 = vmax.f32 %v401_v36, 0.0 }
 0x113   :  { %v415_v40 = vadd.f32 %v413_v35, %v412_v37 }
 0x115   :  { %v416_v42 = vadd.f32 %v415_v40, %v414_v33 }
 0x117   :  { %673 = vmatmul.mubr.msk.f32.vlgmr.msra.gmra.mrb[2].mxu0 %vm425_vm2, %v416_v42 }
 0x118   :  { %708 = vmatpush3.bf16.msra.mxu0 %v707_v41  ;;  %683 = vmatprep.mubr.msk.f32.mxu0 %vm800_vm0, %v801_v1 }
 0x119   :  { %709 = vmatprep.subr.bf16.mxu0 %v799_v0 }
 0x11c   :  { %711 = vmatpush3.bf16.msra.mxu0 %v710_v45 }
 0x11f   :  { %684 = vmatmul.mubr.msk.f32.vlgmr.msra.gmra.mrb[2].mxu0 %vm425_vm2, %v207_v46 }
 0x1f2   :  { %v568_v47 = vpop.f32.mrb[2].mxu0 }
 0x1f3   :  { %v572_v48 = vmax.f32 %v568_v47, 0.0  ;;  %v685_v49 = vpop.f32.mrb[3].mxu0 }
 0x1f5   :  { %573 = vst [vmem:[#allocation7] sm:$0xff] %v572_v48 }
 0x1f6   :  { %780 = shalt.err (!%p777_p6)
}
 0x1f7   :  { %s781_s18 = scalar_lea.hbm %s976_s8, 128 }
 0x1f8   :  { %p782_p7 = scmp.ne.s32.totalorder %s976_s8, %s781_s18  ;;  %p785_p8 = scmp.lt.u32.totalorder %s781_s18, %s976_s8 }
 0x1fa   :  { %p787_p9 = pnand %p785_p8, %p782_p7 }
 0x1fc   :  { %790 = shalt.err (!%p787_p9)
}
 0x1fd   :  { %583 = dma.vmem_to_hbm [thread:$0]  %s581_s15, 128, %s976_s8, [#allocation4]  }
 0x1fe   :  { %795 = dma.done.wait [#allocation4], 128  }
 0x1ff   :  { %796 = vsyncadd [#allocation4], 4294967168 }
 0x200   :  { %587 = vsyncpa [#allocation3], 1 }
 0x201   :  { %588 = vsyncpa [#allocation6], 1 }
 0x202   :  { %589 = vsyncpa [#allocation4], 1 }

</bundles_post_ra>
